<compile_context>
chip_gen: v5e
topology: v5e:2x2
jax: 0.10.0
libtpu: 0.0.40
codegen_flags: <defaults>
</compile_context>

<pallas_src>
import jax
import jax.numpy as jnp
from jax.experimental import pallas as pl
from jax.experimental.pallas import tpu as pltpu


def custom_rnn_kernel(idx_ref,                       # SMEM scalar-prefetch [T, B] int32
                      h0_ref, c0_ref, emb_ref,
                      w_gates_ref, b_gates_ref,
                      wh2o_ref, wh2y_ref, bh2y_ref,
                      y_ref, h_out_ref, c_out_ref):
    f32 = jnp.float32
    t = pl.program_id(0)
    B, H = h0_ref.shape
    V, E = emb_ref.shape

    dot = lambda a, b: jnp.dot(a, b, preferred_element_type=f32)

    # h/c live in the (revisited, VMEM-resident) output blocks across all steps.
    @pl.when(t == 0)
    def _init():
        h_out_ref[...] = h0_ref[...]
        c_out_ref[...] = c0_ref[...]

    h = h_out_ref[...]                    # [B, H]
    c = c_out_ref[...]                    # [B, H]

    # --- embedding lookup -------------------------------------------------
    # Token ids come from SMEM (scalar prefetch); build the one-hot in
    # registers (iota == tok) and do an exact one-hot @ table matmul.
    toks = jnp.concatenate(
        [idx_ref[t, b].reshape(1, 1) for b in range(B)], axis=0)     # [B, 1] int32
    onehot = (jax.lax.broadcasted_iota(jnp.int32, (B, V), 1) == toks).astype(f32)
    x = dot(onehot, emb_ref[...])                                    # [B, E]

    # --- fused gate matmul --------------------------------------------------
    # z = [x | h | c] @ W_gates + b_gates, columns = [i-gate | candidate | o(x,h)]
    zin = jnp.concatenate([x, h, c], axis=1)                         # [B, E+2H]
    z = dot(zin, w_gates_ref[...]) + b_gates_ref[...]                # [B, 3H]

    i_gate = jnp.tanh(z[:, 0:H])
    f_gate = i_gate                       # module's x/h/c "forget" preacts == "input" preacts
    c_new = f_gate * c + i_gate * jnp.tanh(z[:, H:2 * H])

    # o-gate: x/h parts (+ 2*bh2o) already in z; dependent c_new @ wh2o added here.
    o_gate = jnp.tanh(z[:, 2 * H:3 * H] + dot(c_new, wh2o_ref[...]))
    h_new = o_gate * jnp.tanh(c_new)

    y_ref[...] = dot(h_new, wh2y_ref[...]) + bh2y_ref[...]           # [B, V]
    h_out_ref[...] = h_new
    c_out_ref[...] = c_new


def custom_rnn_forward_seq(x_idx_seq, h0, c0, params):
    """Run the cell over a whole sequence in ONE pallas_call.

    x_idx_seq: [T, B] int32 token indices, h0/c0: [B, H] f32.
    Returns (y_seq [T, B, V], h_T [B, H], c_T [B, H]).
    """
    T, B = x_idx_seq.shape
    V, E = params["emb"].shape
    H = h0.shape[-1]

    # One-time fused gate weights/biases (float-add reordering only).
    w_gates = jnp.zeros((E + 2 * H, 3 * H), jnp.float32)
    w_gates = w_gates.at[0:E, 0:H].set(params["wx2i"])
    w_gates = w_gates.at[0:E, H:2 * H].set(params["wx2c"])
    w_gates = w_gates.at[0:E, 2 * H:3 * H].set(params["wx2o"])
    w_gates = w_gates.at[E:E + H, 0:H].set(params["wh2i"])
    w_gates = w_gates.at[E:E + H, H:2 * H].set(params["wh2c"])
    w_gates = w_gates.at[E:E + H, 2 * H:3 * H].set(params["wh2o"])
    w_gates = w_gates.at[E + H:E + 2 * H, 0:H].set(params["wh2c"])
    b_gates = jnp.concatenate(
        [params["bh2i"] + params["bh2c"],       # i-gate bias
         params["bh2c"],                        # candidate bias
         2.0 * params["bh2o"]],                 # o-gate bias (bh2o added twice in the module)
        axis=1)                                 # [1, 3H]

    grid_spec = pltpu.PrefetchScalarGridSpec(
        num_scalar_prefetch=1,                  # x_idx_seq -> SMEM
        grid=(T,),
        in_specs=[
            pl.BlockSpec((B, H), lambda t, idx: (0, 0)),              # h0
            pl.BlockSpec((B, H), lambda t, idx: (0, 0)),              # c0
            pl.BlockSpec((V, E), lambda t, idx: (0, 0)),              # emb (resident)
            pl.BlockSpec((E + 2 * H, 3 * H), lambda t, idx: (0, 0)),  # fused gate weights
            pl.BlockSpec((1, 3 * H), lambda t, idx: (0, 0)),          # fused gate bias
            pl.BlockSpec((H, H), lambda t, idx: (0, 0)),              # wh2o
            pl.BlockSpec((H, V), lambda t, idx: (0, 0)),              # wh2y
            pl.BlockSpec((1, V), lambda t, idx: (0, 0)),              # bh2y
        ],
        out_specs=(
            pl.BlockSpec((None, B, V), lambda t, idx: (t, 0, 0)),     # y per step
            pl.BlockSpec((B, H), lambda t, idx: (0, 0)),              # h state (resident)
            pl.BlockSpec((B, H), lambda t, idx: (0, 0)),              # c state (resident)
        ),
    )

    out_shape = (jax.ShapeDtypeStruct((T, B, V), jnp.float32),
                 jax.ShapeDtypeStruct((B, H), jnp.float32),
                 jax.ShapeDtypeStruct((B, H), jnp.float32))

    return pl.pallas_call(
        custom_rnn_kernel,
        grid_spec=grid_spec,
        out_shape=out_shape,
        compiler_params=pltpu.CompilerParams(
            dimension_semantics=("arbitrary",)),   # time axis carries state
    )(x_idx_seq, h0, c0, params["emb"], w_gates, b_gates,
      params["wh2o"], params["wh2y"], params["bh2y"])


def custom_rnn_forward(x_idx, h, c, params):
    """Single-step forward matching the module signature. x_idx: [B] int32."""
    y_seq, h1, c1 = custom_rnn_forward_seq(x_idx[None, :], h, c, params)
    return y_seq[0], h1, c1


def init_params(key, vocab_size, embedding_dim, hidden_size):
    """Deterministic synthetic parameters. Linear weights stored as [in, out]."""
    ks = jax.random.split(key, 12)
    s = 0.1
    p = {
        "emb":  jax.random.normal(ks[0], (vocab_size, embedding_dim), jnp.float32) * s,
        "wx2i": jax.random.normal(ks[1], (embedding_dim, hidden_size), jnp.float32) * s,
        "wh2i": jax.random.normal(ks[2], (hidden_size, hidden_size), jnp.float32) * s,
        "bh2i": jax.random.normal(ks[3], (1, hidden_size), jnp.float32) * s,
        "wh2c": jax.random.normal(ks[4], (hidden_size, hidden_size), jnp.float32) * s,
        "bh2c": jax.random.normal(ks[5], (1, hidden_size), jnp.float32) * s,
        "wx2c": jax.random.normal(ks[6], (embedding_dim, hidden_size), jnp.float32) * s,
        "wx2o": jax.random.normal(ks[7], (embedding_dim, hidden_size), jnp.float32) * s,
        "wh2o": jax.random.normal(ks[8], (hidden_size, hidden_size), jnp.float32) * s,
        "bh2o": jax.random.normal(ks[9], (1, hidden_size), jnp.float32) * s,
        "wh2y": jax.random.normal(ks[10], (hidden_size, vocab_size), jnp.float32) * s,
        "bh2y": jax.random.normal(ks[11], (1, vocab_size), jnp.float32) * s,
    }
    # TODO(synk): x2f, h2f, c2i, c2f, c2o exist in __init__ but are unused in
    # forward; they are intentionally not materialized.
    return p


def reference_step(x_idx, h, c, p):
    """Pure-JAX reference mirroring the PyTorch forward exactly (quirks included)."""
    x = p["emb"][x_idx]
    x_input = x @ p["wx2i"]
    h_input = h @ p["wh2i"] + p["bh2i"]
    c_input = c @ p["wh2c"] + p["bh2c"]
    i = jnp.tanh(x_input + h_input + c_input)
    f = jnp.tanh(x @ p["wx2i"] + (h @ p["wh2i"] + p["bh2i"]) + (c @ p["wh2c"] + p["bh2c"]))
    c_new = f * c + i * jnp.tanh(x @ p["wx2c"] + (h @ p["wh2c"] + p["bh2c"]))
    o = jnp.tanh(x @ p["wx2o"] + (h @ p["wh2o"] + p["bh2o"])
                 + (c_new @ p["wh2o"] + p["bh2o"]))
    h_new = o * jnp.tanh(c_new)
    y = h_new @ p["wh2y"] + p["bh2y"]
    return y, h_new, c_new


def reference_seq(x_idx_seq, h, c, p):
    ys = []
    for t in range(x_idx_seq.shape[0]):
        y, h, c = reference_step(x_idx_seq[t], h, c, p)
        ys.append(y)
    return jnp.stack(ys, axis=0), h, c


if __name__ == "__main__":
    T, B, V, E, H = 8, 2, 64, 32, 32

    key = jax.random.PRNGKey(0)
    k_par, k_idx, k_h, k_c = jax.random.split(key, 4)

    params = init_params(k_par, V, E, H)
    x_idx_seq = jax.random.randint(k_idx, (T, B), 0, V, dtype=jnp.int32)
    h0 = jax.random.normal(k_h, (B, H), jnp.float32) * 0.1
    c0 = jax.random.normal(k_c, (B, H), jnp.float32) * 0.1

    # Full-sequence kernel (time loop inside the pallas_call).
    y_seq, h_T, c_T = custom_rnn_forward_seq(x_idx_seq, h0, c0, params)
    jax.block_until_ready((y_seq, h_T, c_T))

    y_ref, h_ref, c_ref = reference_seq(x_idx_seq, h0, c0, params)
    assert jnp.allclose(y_seq, y_ref, atol=1e-5, rtol=1e-5)
    assert jnp.allclose(h_T, h_ref, atol=1e-5, rtol=1e-5)
    assert jnp.allclose(c_T, c_ref, atol=1e-5, rtol=1e-5)

    # Single-step API (matches the module's forward signature) also checked.
    y1, h1, c1 = custom_rnn_forward(x_idx_seq[0], h0, c0, params)
    jax.block_until_ready((y1, h1, c1))
    y1_ref, h1_ref, c1_ref = reference_step(x_idx_seq[0], h0, c0, params)
    assert jnp.allclose(y1, y1_ref, atol=1e-5, rtol=1e-5)
    assert jnp.allclose(h1, h1_ref, atol=1e-5, rtol=1e-5)
    assert jnp.allclose(c1, c1_ref, atol=1e-5, rtol=1e-5)

    print("KERNEL_OK")
</pallas_src>

<mosaic_0001>
module attributes {stable_mosaic.version = 11 : i64} {
  func.func @custom_rnn_kernel(%arg0: i32, %arg1: memref<8x2xi32, #tpu.memory_space<smem>>, %arg2: memref<2x32xf32, #tpu.memory_space<vmem>>, %arg3: memref<2x32xf32, #tpu.memory_space<vmem>>, %arg4: memref<64x32xf32, #tpu.memory_space<vmem>>, %arg5: memref<96x96xf32, #tpu.memory_space<vmem>>, %arg6: memref<1x96xf32, #tpu.memory_space<vmem>>, %arg7: memref<32x32xf32, #tpu.memory_space<vmem>>, %arg8: memref<32x64xf32, #tpu.memory_space<vmem>>, %arg9: memref<1x64xf32, #tpu.memory_space<vmem>>, %arg10: memref<1x2x64xf32, #tpu.memory_space<vmem>>, %arg11: memref<2x32xf32, #tpu.memory_space<vmem>>, %arg12: memref<2x32xf32, #tpu.memory_space<vmem>>) attributes {dimension_semantics = [#tpu.dimension_semantics<arbitrary>], iteration_bounds = array<i64: 8>, scalar_prefetch = 1 : i64, scratch_operands = 0 : i64, tpu.core_type = #tpu.core_type<tc>, window_params = [{pipeline_mode = #tpu.pipeline_mode<synchronous>, transform_indices = @transform_0, window_bounds = array<i64: 2, 32>}, {pipeline_mode = #tpu.pipeline_mode<synchronous>, transform_indices = @transform_1, window_bounds = array<i64: 2, 32>}, {pipeline_mode = #tpu.pipeline_mode<synchronous>, transform_indices = @transform_2, window_bounds = array<i64: 64, 32>}, {pipeline_mode = #tpu.pipeline_mode<synchronous>, transform_indices = @transform_3, window_bounds = array<i64: 96, 96>}, {pipeline_mode = #tpu.pipeline_mode<synchronous>, transform_indices = @transform_4, window_bounds = array<i64: 1, 96>}, {pipeline_mode = #tpu.pipeline_mode<synchronous>, transform_indices = @transform_5, window_bounds = array<i64: 32, 32>}, {pipeline_mode = #tpu.pipeline_mode<synchronous>, transform_indices = @transform_6, window_bounds = array<i64: 32, 64>}, {pipeline_mode = #tpu.pipeline_mode<synchronous>, transform_indices = @transform_7, window_bounds = array<i64: 1, 64>}, {transform_indices = @transform_8, window_bounds = array<i64: 1, 2, 64>}, {pipeline_mode = #tpu.pipeline_mode<synchronous>, transform_indices = @transform_9, window_bounds = array<i64: 2, 32>}, {pipeline_mode = #tpu.pipeline_mode<synchronous>, transform_indices = @transform_10, window_bounds = array<i64: 2, 32>}]} {
    %c0_i32 = arith.constant 0 : i32
    %0 = arith.cmpi eq, %arg0, %c0_i32 : i32
    %1 = arith.extui %0 : i1 to i32
    %c0_i32_0 = arith.constant 0 : i32
    %2 = arith.cmpi ne, %1, %c0_i32_0 : i32
    scf.if %2 {
      %c0_27 = arith.constant 0 : index
      %c0_28 = arith.constant 0 : index
      %49 = vector.load %arg2[%c0_27, %c0_28] : memref<2x32xf32, #tpu.memory_space<vmem>>, vector<2x32xf32>
      %c0_29 = arith.constant 0 : index
      %c0_30 = arith.constant 0 : index
      %50 = vector.load %arg11[%c0_29, %c0_30] : memref<2x32xf32, #tpu.memory_space<vmem>>, vector<2x32xf32>
      tpu.vector_store %arg11[%c0_29, %c0_30], %49 {strides = array<i32>} : memref<2x32xf32, #tpu.memory_space<vmem>>, vector<2x32xf32>,
      %c0_31 = arith.constant 0 : index
      %c0_32 = arith.constant 0 : index
      %51 = vector.load %arg3[%c0_31, %c0_32] : memref<2x32xf32, #tpu.memory_space<vmem>>, vector<2x32xf32>
      %c0_33 = arith.constant 0 : index
      %c0_34 = arith.constant 0 : index
      %52 = vector.load %arg12[%c0_33, %c0_34] : memref<2x32xf32, #tpu.memory_space<vmem>>, vector<2x32xf32>
      tpu.vector_store %arg12[%c0_33, %c0_34], %51 {strides = array<i32>} : memref<2x32xf32, #tpu.memory_space<vmem>>, vector<2x32xf32>,
    } else {
    }
    %c0 = arith.constant 0 : index
    %c0_1 = arith.constant 0 : index
    %3 = vector.load %arg11[%c0, %c0_1] : memref<2x32xf32, #tpu.memory_space<vmem>>, vector<2x32xf32>
    %c0_2 = arith.constant 0 : index
    %c0_3 = arith.constant 0 : index
    %4 = vector.load %arg12[%c0_2, %c0_3] : memref<2x32xf32, #tpu.memory_space<vmem>>, vector<2x32xf32>
    %5 = arith.index_cast %arg0 : i32 to index
    %c0_4 = arith.constant 0 : index
    %6 = memref.load %arg1[%5, %c0_4] : memref<8x2xi32, #tpu.memory_space<smem>>
    %7 = vector.broadcast %6 : i32 to vector<1x1xi32>
    %8 = arith.index_cast %arg0 : i32 to index
    %c1 = arith.constant 1 : index
    %9 = memref.load %arg1[%8, %c1] : memref<8x2xi32, #tpu.memory_space<smem>>
    %10 = vector.broadcast %9 : i32 to vector<1x1xi32>
    %11 = tpu.concatenate %7, %10 in 0 : vector<1x1xi32>, vector<1x1xi32> -> vector<2x1xi32>
    %12 = tpu.iota {dimensions = array<i32: 1>} : vector<2x64xi32>
    %13 = vector.broadcast %11 : vector<2x1xi32> to vector<2x64xi32>
    %14 = arith.cmpi eq, %12, %13 : vector<2x64xi32>
    %15 = arith.extui %14 : vector<2x64xi1> to vector<2x64xi32>
    %16 = arith.sitofp %15 : vector<2x64xi32> to vector<2x64xf32>
    %c0_5 = arith.constant 0 : index
    %c0_6 = arith.constant 0 : index
    %17 = vector.load %arg4[%c0_5, %c0_6] : memref<64x32xf32, #tpu.memory_space<vmem>>, vector<64x32xf32>
    %cst = arith.constant dense<0.000000e+00> : vector<2x32xf32>
    %18 = tpu.matmul %16, %17, %cst {dimension_numbers = #tpu.dot_dimension_numbers<[1], [0], [0], [1], [0, 0, 1, 1], [], []>} : vector<2x64xf32>, vector<64x32xf32>, vector<2x32xf32> -> vector<2x32xf32>
    %19 = tpu.concatenate %18, %3, %4 in 1 : vector<2x32xf32>, vector<2x32xf32>, vector<2x32xf32> -> vector<2x96xf32>
    %c0_7 = arith.constant 0 : index
    %c0_8 = arith.constant 0 : index
    %20 = vector.load %arg5[%c0_7, %c0_8] : memref<96x96xf32, #tpu.memory_space<vmem>>, vector<96x96xf32>
    %cst_9 = arith.constant dense<0.000000e+00> : vector<2x96xf32>
    %21 = tpu.matmul %19, %20, %cst_9 {dimension_numbers = #tpu.dot_dimension_numbers<[1], [0], [0], [1], [0, 0, 1, 1], [], []>} : vector<2x96xf32>, vector<96x96xf32>, vector<2x96xf32> -> vector<2x96xf32>
    %c0_10 = arith.constant 0 : index
    %c0_11 = arith.constant 0 : index
    %22 = vector.load %arg6[%c0_10, %c0_11] : memref<1x96xf32, #tpu.memory_space<vmem>>, vector<1x96xf32>
    %23 = vector.broadcast %22 : vector<1x96xf32> to vector<2x96xf32>
    %24 = arith.addf %21, %23 : vector<2x96xf32>
    %25 = vector.extract_strided_slice %24 {offsets = [0, 0], sizes = [2, 32], strides = [1, 1]} : vector<2x96xf32> to vector<2x32xf32>
    %26 = math.tanh %25 : vector<2x32xf32>
    %27 = arith.mulf %26, %4 : vector<2x32xf32>
    %28 = vector.extract_strided_slice %24 {offsets = [0, 32], sizes = [2, 32], strides = [1, 1]} : vector<2x96xf32> to vector<2x32xf32>
    %29 = math.tanh %28 : vector<2x32xf32>
    %30 = arith.mulf %26, %29 : vector<2x32xf32>
    %31 = arith.addf %27, %30 : vector<2x32xf32>
    %32 = vector.extract_strided_slice %24 {offsets = [0, 64], sizes = [2, 32], strides = [1, 1]} : vector<2x96xf32> to vector<2x32xf32>
    %c0_12 = arith.constant 0 : index
    %c0_13 = arith.constant 0 : index
    %33 = vector.load %arg7[%c0_12, %c0_13] : memref<32x32xf32, #tpu.memory_space<vmem>>, vector<32x32xf32>
    %cst_14 = arith.constant dense<0.000000e+00> : vector<2x32xf32>
    %34 = tpu.matmul %31, %33, %cst_14 {dimension_numbers = #tpu.dot_dimension_numbers<[1], [0], [0], [1], [0, 0, 1, 1], [], []>} : vector<2x32xf32>, vector<32x32xf32>, vector<2x32xf32> -> vector<2x32xf32>
    %35 = arith.addf %32, %34 : vector<2x32xf32>
    %36 = math.tanh %35 : vector<2x32xf32>
    %37 = math.tanh %31 : vector<2x32xf32>
    %38 = arith.mulf %36, %37 : vector<2x32xf32>
    %c0_15 = arith.constant 0 : index
    %c0_16 = arith.constant 0 : index
    %39 = vector.load %arg8[%c0_15, %c0_16] : memref<32x64xf32, #tpu.memory_space<vmem>>, vector<32x64xf32>
    %cst_17 = arith.constant dense<0.000000e+00> : vector<2x64xf32>
    %40 = tpu.matmul %38, %39, %cst_17 {dimension_numbers = #tpu.dot_dimension_numbers<[1], [0], [0], [1], [0, 0, 1, 1], [], []>} : vector<2x32xf32>, vector<32x64xf32>, vector<2x64xf32> -> vector<2x64xf32>
    %c0_18 = arith.constant 0 : index
    %c0_19 = arith.constant 0 : index
    %41 = vector.load %arg9[%c0_18, %c0_19] : memref<1x64xf32, #tpu.memory_space<vmem>>, vector<1x64xf32>
    %42 = vector.broadcast %41 : vector<1x64xf32> to vector<2x64xf32>
    %43 = arith.addf %40, %42 : vector<2x64xf32>
    %c0_20 = arith.constant 0 : index
    %c0_21 = arith.constant 0 : index
    %c0_22 = arith.constant 0 : index
    %44 = vector.load %arg10[%c0_20, %c0_21, %c0_22] : memref<1x2x64xf32, #tpu.memory_space<vmem>>, vector<1x2x64xf32>
    %45 = vector.shape_cast %44 : vector<1x2x64xf32> to vector<2x64xf32>
    %46 = vector.shape_cast %43 : vector<2x64xf32> to vector<1x2x64xf32>
    tpu.vector_store %arg10[%c0_20, %c0_21, %c0_22], %46 {strides = array<i32>} : memref<1x2x64xf32, #tpu.memory_space<vmem>>, vector<1x2x64xf32>,
    %c0_23 = arith.constant 0 : index
    %c0_24 = arith.constant 0 : index
    %47 = vector.load %arg11[%c0_23, %c0_24] : memref<2x32xf32, #tpu.memory_space<vmem>>, vector<2x32xf32>
    tpu.vector_store %arg11[%c0_23, %c0_24], %38 {strides = array<i32>} : memref<2x32xf32, #tpu.memory_space<vmem>>, vector<2x32xf32>,
    %c0_25 = arith.constant 0 : index
    %c0_26 = arith.constant 0 : index
    %48 = vector.load %arg12[%c0_25, %c0_26] : memref<2x32xf32, #tpu.memory_space<vmem>>, vector<2x32xf32>
    tpu.vector_store %arg12[%c0_25, %c0_26], %31 {strides = array<i32>} : memref<2x32xf32, #tpu.memory_space<vmem>>, vector<2x32xf32>,
    return
  }
  func.func @transform_0(%arg0: i32, %arg1: memref<8x2xi32, #tpu.memory_space<smem>>) -> (i32, i32) {
    %c0_i32 = arith.constant 0 : i32
    %c0_i32_0 = arith.constant 0 : i32
    %c0_i32_1 = arith.constant 0 : i32
    return %c0_i32, %c0_i32_0 : i32, i32
  }
  func.func @transform_1(%arg0: i32, %arg1: memref<8x2xi32, #tpu.memory_space<smem>>) -> (i32, i32) {
    %c0_i32 = arith.constant 0 : i32
    %c0_i32_0 = arith.constant 0 : i32
    %c0_i32_1 = arith.constant 0 : i32
    return %c0_i32, %c0_i32_0 : i32, i32
  }
  func.func @transform_2(%arg0: i32, %arg1: memref<8x2xi32, #tpu.memory_space<smem>>) -> (i32, i32) {
    %c0_i32 = arith.constant 0 : i32
    %c0_i32_0 = arith.constant 0 : i32
    %c0_i32_1 = arith.constant 0 : i32
    return %c0_i32, %c0_i32_0 : i32, i32
  }
  func.func @transform_3(%arg0: i32, %arg1: memref<8x2xi32, #tpu.memory_space<smem>>) -> (i32, i32) {
    %c0_i32 = arith.constant 0 : i32
    %c0_i32_0 = arith.constant 0 : i32
    %c0_i32_1 = arith.constant 0 : i32
    return %c0_i32, %c0_i32_0 : i32, i32
  }
  func.func @transform_4(%arg0: i32, %arg1: memref<8x2xi32, #tpu.memory_space<smem>>) -> (i32, i32) {
    %c0_i32 = arith.constant 0 : i32
    %c0_i32_0 = arith.constant 0 : i32
    %c0_i32_1 = arith.constant 0 : i32
    return %c0_i32, %c0_i32_0 : i32, i32
  }
  func.func @transform_5(%arg0: i32, %arg1: memref<8x2xi32, #tpu.memory_space<smem>>) -> (i32, i32) {
    %c0_i32 = arith.constant 0 : i32
    %c0_i32_0 = arith.constant 0 : i32
    %c0_i32_1 = arith.constant 0 : i32
    return %c0_i32, %c0_i32_0 : i32, i32
  }
  func.func @transform_6(%arg0: i32, %arg1: memref<8x2xi32, #tpu.memory_space<smem>>) -> (i32, i32) {
    %c0_i32 = arith.constant 0 : i32
    %c0_i32_0 = arith.constant 0 : i32
    %c0_i32_1 = arith.constant 0 : i32
    return %c0_i32, %c0_i32_0 : i32, i32
  }
  func.func @transform_7(%arg0: i32, %arg1: memref<8x2xi32, #tpu.memory_space<smem>>) -> (i32, i32) {
    %c0_i32 = arith.constant 0 : i32
    %c0_i32_0 = arith.constant 0 : i32
    %c0_i32_1 = arith.constant 0 : i32
    return %c0_i32, %c0_i32_0 : i32, i32
  }
  func.func @transform_8(%arg0: i32, %arg1: memref<8x2xi32, #tpu.memory_space<smem>>) -> (i32, i32, i32) {
    %c0_i32 = arith.constant 0 : i32
    %c0_i32_0 = arith.constant 0 : i32
    %c0_i32_1 = arith.constant 0 : i32
    return %arg0, %c0_i32, %c0_i32_0 : i32, i32, i32
  }
  func.func @transform_9(%arg0: i32, %arg1: memref<8x2xi32, #tpu.memory_space<smem>>) -> (i32, i32) {
    %c0_i32 = arith.constant 0 : i32
    %c0_i32_0 = arith.constant 0 : i32
    %c0_i32_1 = arith.constant 0 : i32
    return %c0_i32, %c0_i32_0 : i32, i32
  }
  func.func @transform_10(%arg0: i32, %arg1: memref<8x2xi32, #tpu.memory_space<smem>>) -> (i32, i32) {
    %c0_i32 = arith.constant 0 : i32
    %c0_i32_0 = arith.constant 0 : i32
    %c0_i32_1 = arith.constant 0 : i32
    return %c0_i32, %c0_i32_0 : i32, i32
  }
}

</mosaic_0001>

<bundles_post_ra>
// kernel: tpu_custom_call.1
= control target key start
LH: loop header
LB: loop body
LE: loop exit
PB: predicated region body
PF: predicated region fallthrough
CT: control target
= control target key end

     0   :  { %s1025_s20 = smov [#allocation3]   ;;  %s1317_s0 = inlined_call_operand.vmem [shape: s32[8,2], index: 0, kind: input, shape index: {}]   ;;  %s1318_s1 = inlined_call_operand.vmem [shape: f32[2,32], index: 1, kind: input, shape index: {}]   ;;  %s1319_s2 = inlined_call_operand.vmem [shape: f32[2,32], index: 2, kind: input, shape index: {}]   ;;  %s1320_s3 = inlined_call_operand.vmem [shape: f32[64,32], index: 3, kind: input, shape index: {}]   ;;  %s1321_s4 = inlined_call_operand.vmem [shape: f32[96,96], index: 4, kind: input, shape index: {}]   ;;  %s1322_s5 = inlined_call_operand.vmem [shape: f32[1,96], index: 5, kind: input, shape index: {}]   ;;  %s1323_s6 = inlined_call_operand.hbm [shape: f32[32,32], index: 6, kind: input, shape index: {}]   ;;  %s1324_s7 = inlined_call_operand.hbm [shape: f32[32,64], index: 7, kind: input, shape index: {}]   ;;  %s1325_s8 = inlined_call_operand.vmem [shape: f32[1,64], index: 8, kind: input, shape index: {}]   ;;  %s1326_s9 = inlined_call_operand.hbm [shape: f32[8,2,64], index: 9, kind: output, shape index: {0}]   ;;  %s1327_s10 = inlined_call_operand.hbm [shape: f32[2,32], index: 10, kind: output, shape index: {1}]   ;;  %s1328_s11 = inlined_call_operand.hbm [shape: f32[2,32], index: 11, kind: output, shape index: {2}]  }
   0x1   :  { %1330 = sst [smem:[#allocation19_spill]] %s1318_s1  ;;  %s18_s19 = sshll.u32 %s1317_s0, 4  ;;  %s19_s19 = int_to_ptr.vmem [resolvable:$true] %s18_s19 }
   0x2   :  { %1331 = sst [smem:[#allocation20_spill]] %s1319_s2 }
   0x3   :  { %21 = dma.vmem_to_smem %s19_s19, 128, %s1025_s20, [#allocation2] }
   0x4   :  { %991 = dma.done.wait [#allocation2], 128 }
   0x5   :  { %992 = vsyncadd [#allocation2], 4294967168 }
   0x6   :  { %24 = sfence }
   0x7   :  { %25 = vsyncpa [#allocation5], 0 }
   0x8   :  { %26 = vsyncpa [#allocation8], 0 }
   0x9   :  { %27 = vsyncpa [#allocation6], 0 }
   0xa   :  { %29 = vsyncpa [#allocation6 + $0x1], 0 }
   0xb   :  { %30 = vsyncpa [#allocation11], 0  ;;  %s1100_s21 = smov 0   ;;  %s1102_s22 = smov 0  }
   0xc   :  { %s1104_s23 = smov 0   ;;  %s1106_s24 = smov 0  }
   0xd LB: > { %s1121_s0 = sadd.s32 4294967295, %s1023_s24   ;;  %s705_s25 = sadd.s32 4294967294, %s1023_s24   ;;  %s1023_s24 = sphi %s1106_s24, %s1345_s24   ;;  %s1019_s23 = sphi %s1104_s23, %s1344_s23   ;;  %s1015_s22 = sphi %s1102_s22, %s1343_s22   ;;  %s1011_s21 = sphi %s1100_s21, %s1342_s21  }
   0xe   : > { %s1125_s26 = sadd.s32 1, %s1023_s24   ;;  %s211_s27 = sadd.s32 1, %s1019_s23 }
   0xf   : > { %s208_s28 = ssub.s32 %s1023_s24, %s1125_s26  ;;  %p221_p0 = scmp.ne.s32.totalorder %s1019_s23, %s1015_s22 }
  0x10   : > { %p209_p1 = scmp.eq.s32.totalorder %s208_s28, 0  ;;  %p222_p2 = scmp.eq.s32.totalorder %s1121_s0, 7 }
  0x11   : > { %p227_p3 = scmp.ne.s32.totalorder %s1015_s22, %s1011_s21  ;;  %p228_p4 = scmp.eq.s32.totalorder %s705_s25, 7 }
  0x12   : > { %s1136_s29 = scalar_select %p209_p1, %s1019_s23, %s211_s27  }
  0x13   : > { %p1140_p5 = por %p222_p2, %p221_p0  ;;  %p1144_p6 = por %p228_p4, %p227_p3 }
  0x14   : > { %1332 = sst [smem:[#allocation18_spill]] %s1136_s29  ;;  %p706_p7 = scmp.ge.s32.totalorder %s1023_s24, 1 }
  0x15   : > { %p277_p8 = scmp.lt.s32.totalorder %s1023_s24, 9  ;;  %p707_p9 = scmp.ne.s32.totalorder %s1121_s0, 0 }
  0x16   : > { %p757_p10 = scmp.eq.s32.totalorder %s1121_s0, 0  ;;  %s303_s16 = sshll.u32 %s1323_s6, 4  ;;  %s304_s16 = int_to_ptr.hbm [resolvable:$true] %s303_s16 }
  0x17   : > { %p1152_p11 = pnand %p706_p7, %p277_p8  ;;  %s1026_s17 = smov [#allocation4]  }
  0x18   : > { %s305_s18 = sshll.u32 %s1026_s17, 4  ;;  %s317_s25 = sshll.u32 %s1324_s7, 4  ;;  %s306_s18 = int_to_ptr.vmem [resolvable:$true] %s305_s18  ;;  %s318_s25 = int_to_ptr.hbm [resolvable:$true] %s317_s25 }
  0x19   : > { %p746_p12 = pneg %p1152_p11  ;;  %s1027_s27 = smov 128  }
  0x1a   : > { %s1028_s28 = smov 8   ;;  %s1029_s29 = smov [#allocation7]  }
  0x1b   : > { %p747_p13 = pnand %p757_p10, %p746_p12  ;;  %s319_s14 = sshll.u32 %s1029_s29, 4  ;;  %s320_s14 = int_to_ptr.vmem [resolvable:$true] %s319_s14 }
  0x1c   : > { %338 = sbr.rel (%p1152_p11) target bundleno = 1043 (0x413), region = 52 }
  0x1d   : > { %749 = dma.hbm_to_vmem [thread:$0]  (!%p747_p13), %s304_s16, 512, %s306_s18, [#allocation5], %s1027_s27, %s1027_s27, %s1028_s28  }
  0x1e   : > { %752 = dma.hbm_to_vmem [thread:$0]  (!%p747_p13), %s318_s25, 512, %s320_s14, [#allocation8], %s1027_s27, %s1027_s27, %s1028_s28  }
  0x21   : > { %994 = dma.done.wait (%p757_p10), [#allocation5], 512  }
  0x22   : > { %996 = vsyncadd (%p757_p10), [#allocation5], 4294966784 }
  0x23   : > { %998 = dma.done.wait (%p757_p10), [#allocation8], 512  }
  0x24   : > { %1000 = vsyncadd (%p757_p10), [#allocation8], 4294966784  ;;  %s1329_s29 = sand.u32 1, %s1015_s22   ;;  %380 = sbr.rel (%p707_p9) target bundleno = 46 (0x2e), region = 64 }
  0x25   : > { %s1179_s15 = sshll.u32 %s1329_s29, 1  ;;  %s1336_s1 = sld [smem:[#allocation19_spill]] (!%p707_p9) }
  0x26   : > { %s1337_s2 = sld [smem:[#allocation20_spill]] (!%p707_p9) }
  0x29   : > { %vm382_vm0 = vcmask 254976  }
  0x2b   : > { %v381_v0 = vld [vmem:[%s1336_s1] sm:$0x3] }
  0x2c   : > { %v384_v1 = vld [vmem:[%s1337_s2] sm:$0x3]  ;;  %383 = vst.msk [vmem:[#allocation10] sm:$0x3] %vm382_vm0, %v381_v0 }
  0x2d   : > { %385 = vst.msk [vmem:[#allocation12] sm:$0x3] %vm382_vm0, %v384_v1 }
  0x2e PF: > { %s714_s20 = sshll.u32 %s1121_s0, 7  ;;  %v411_v2 = vld [vmem:[%s1320_s3 + $0x38] sm:$0xff]  ;;  %v410_v3 = vld [vmem:[%s1320_s3 + $0x30] sm:$0xff]  ;;  %v1030_v4 = vmov 0   ;;  %v409_v5 = vld [vmem:[%s1320_s3 + $0x28] sm:$0xff]  ;;  %vm394_vm1 = vcmask 1040384   ;;  %v396_v26 = vlaneseq }
  0x2f   : > { %810 = vset.pattern.permute.xlu0 %v1030_v4  ;;  %s389_s16 = sld [smem:[#allocation3 + %s714_s20]]  ;;  %s391_s17 = sadd.s32 1, %s714_s20  ;;  %424 = vmatpush.msra.mxu0 %v411_v2  ;;  %v408_v6 = vld [vmem:[%s1320_s3 + $0x20] sm:$0xff]  ;;  %v407_v7 = vld [vmem:[%s1320_s3 + $0x18] sm:$0xff]  ;;  %v406_v10 = vld [vmem:[%s1320_s3 + $0x10] sm:$0xff]  ;;  %vm412_vm2 = vcmask 523264  }
  0x30   : > { %s392_s18 = sld [smem:[#allocation3 + %s391_s17]]  ;;  %v405_v12 = vld [vmem:[%s1320_s3 + $0x8] sm:$0xff]  ;;  %v404_v13 = vld [vmem:[%s1320_s3] sm:$0xff]  ;;  %v458_v16 = vld [vmem:[%s1321_s4 + $0x58] sm:$0xff]  ;;  %s1032_s19 = smov 64   ;;  %v397_v27 = vand.u32 127, %v396_v26 }
  0x31   : > { %425 = vmatpush.msra.mxu0 %v410_v3  ;;  %v457_v17 = vld [vmem:[%s1321_s4 + $0x50] sm:$0xff]  ;;  %471 = vmatpush.msra.mxu1 %v458_v16  ;;  %v456_v18 = vld [vmem:[%s1321_s4 + $0x48] sm:$0xff]  ;;  %v455_v19 = vld [vmem:[%s1321_s4 + $0x40] sm:$0xff]  ;;  %v1033_v29 = vmov 0.0   ;;  %vm444_vm4 = vcmask 261120   ;;  %vm463_vm5 = vcmask 785408  }
  0x32   : > { %v454_v20 = vld [vmem:[%s1321_s4 + $0x38] sm:$0xff]  ;;  %v453_v21 = vld [vmem:[%s1321_s4 + $0x30] sm:$0xff]  ;;  %v452_v22 = vld [vmem:[%s1321_s4 + $0x28] sm:$0xff]  ;;  %s1034_s20 = smov 96   ;;  %vm570_vm6 = vcmask 254976   ;;  %s1035_s28 = smov [#allocation10]  }
  0x33   : > { %426 = vmatpush.msra.mxu0 %v409_v5  ;;  %v386_v14 = vld [vmem:[#allocation10] sm:$0x3]  ;;  %472 = vmatpush.msra.mxu1 %v457_v17  ;;  %v450_v24 = vld [vmem:[%s1321_s4 + $0x18] sm:$0xff]  ;;  %v449_v25 = vld [vmem:[%s1321_s4 + $0x10] sm:$0xff]  ;;  %s598_s29 = sshll.u32 %s1035_s28, 4  ;;  %s600_s13 = sshll.u32 %s1327_s10, 4  ;;  %s599_s29 = int_to_ptr.vmem [resolvable:$true] %s598_s29  ;;  %s601_s13 = int_to_ptr.hbm [resolvable:$true] %s600_s13 }
  0x34   : > { %v387_v15 = vld [vmem:[#allocation12] sm:$0x3]  ;;  %v448_v31 = vld [vmem:[%s1321_s4 + $0x8] sm:$0xff]  ;;  %v498_v38 = vld [vmem:[#allocation4 + $0x18] sm:$0xff]  ;;  %s721_s27 = sshll.u32 %s1121_s0, 1  ;;  %vm567_vm7 = vcmask 517120  }
  0x35   : > { %v390_v8 = vstv %s389_s16  ;;  %427 = vmatpush.msra.mxu0 %v408_v6  ;;  %441 = vrot.lane.b32.xlu1 %v387_v15, %s1032_s19  ;;  %v451_v23 = vld [vmem:[%s1321_s4 + $0x20] sm:$0xff]  ;;  %v497_v39 = vld [vmem:[#allocation4 + $0x10] sm:$0xff]  ;;  %v496_v44 = vld [vmem:[#allocation4 + $0x8] sm:$0xff]  ;;  %s584_s14 = scalar_lea.hbm %s1326_s9, %s721_s27 }
  0x36   : > { %v393_v9 = vstv %s392_s18  ;;  %s1031_s18 = smov 32   ;;  %473 = vmatpush.msra.mxu1 %v456_v18  ;;  %v447_v32 = vld [vmem:[%s1321_s4] sm:$0xff]  ;;  %514 = vmatpush.msra.mxu2 %v498_v38  ;;  %v537_v52 = vld [vmem:[#allocation7 + $0x18] sm:$0xff]  ;;  %v536_v53 = vld [vmem:[#allocation7 + $0x10] sm:$0xff]  ;;  %s588_s17 = sshll.u32 %s584_s14, 4  ;;  %s589_s17 = int_to_ptr.hbm [resolvable:$true] %s588_s17 }
  0x37   : > { %v395_v11 = vsel %vm394_vm1, %v390_v8, %v393_v9  ;;  %428 = vmatpush.msra.mxu0 %v407_v7  ;;  %v811_v40 = vld [vmem:[%s1322_s5] ss:$0 sm:$0xff]  ;;  %559 = vmatpush.msra.mxu3 %v537_v52  ;;  %v535_v54 = vld [vmem:[#allocation7 + $0x8] sm:$0xff]  ;;  %s961_s2 = sshra.s32 %s589_s17, 4  ;;  %s967_s14 = scalar_lea.hbm %s1326_s9, 16  ;;  %s962_s2 = int_to_ptr.hbm [resolvable:$true] %s961_s2 }
  0x38   : > { %399 = vperm.xlu0 %810, %v395_v11   ;;  %474 = vmatpush.msra.mxu1 %v455_v19  ;;  %v495_v45 = vld [vmem:[#allocation4] sm:$0xff]  ;;  %p968_p4 = scmp.lt.s32.totalorder %s962_s2, %s1326_s9 }
  0x39   : > { %429 = vmatpush.msra.mxu0 %v406_v10  ;;  %515 = vmatpush.msra.mxu2 %v497_v39  ;;  %v534_v55 = vld [vmem:[#allocation7] sm:$0xff] }
  0x3a   : > { %475 = vmatpush.msra.mxu1 %v454_v20  ;;  %560 = vmatpush.msra.mxu3 %v536_v53  ;;  %v812_v62 = vld [vmem:[%s1325_s8] ss:$0 sm:$0xff] }
  0x3b   : > { %430 = vmatpush.msra.mxu0 %v405_v12  ;;  %516 = vmatpush.msra.mxu2 %v496_v44 }
  0x3c   : > { %476 = vmatpush.msra.mxu1 %v453_v21  ;;  %561 = vmatpush.msra.mxu3 %v535_v54 }
  0x3d   : > { %431 = vmatpush.msra.mxu0 %v404_v13  ;;  %517 = vmatpush.msra.mxu2 %v495_v45 }
  0x3e   : > { %477 = vmatpush.msra.mxu1 %v452_v22  ;;  %562 = vmatpush.msra.mxu3 %v534_v55 }
  0x40   : > { %437 = vrot.lane.b32.xlu0 %v386_v14, %s1031_s18  ;;  %478 = vmatpush.msra.mxu1 %v451_v23  ;;  %s1036_s18 = smov [#allocation12]  }
  0x41   : > { %s610_s25 = sshll.u32 %s1036_s18, 4  ;;  %s611_s25 = int_to_ptr.vmem [resolvable:$true] %s610_s25 }
  0x42   : > { %479 = vmatpush.msra.mxu1 %v450_v24 }
  0x44   : > { %480 = vmatpush.msra.mxu1 %v449_v25 }
  0x46   : > { %481 = vmatpush.msra.mxu1 %v448_v31 }
  0x48   : > { %482 = vmatpush.msra.mxu1 %v447_v32 }
  0xa7   : > { %v442_v34 = vpop.permute.xlu1 %441 }
  0xaa   : > { %v400_v28 = vpop.permute.xlu0 %399 }
  0xab   : > { %vm401_vm3 = vcmp.eq.s32.totalorder %v397_v27, %v400_v28 }
  0xac   : > { %v715_v30 = vsel %vm401_vm3, 1.0, %v1033_v29 }
  0xad   : > { %716 = vmatmul.msk.f32.vlgmr.msra.gmra.mxu0 %vm412_vm2, %v715_v30 }
  0xb2   : > { %v438_v33 = vpop.permute.xlu0 %437 }
 0x12a   : > { %v433_v35 = vpop.f32.mrf.mxu0 }
 0x12b   : > { %v445_v36 = vsel %vm444_vm4, %v433_v35, %v438_v33 }
 0x12c   : > { %v446_v37 = vsel %vm412_vm2, %v445_v36, %v442_v34 }
 0x12d   : > { %717 = vmatmul.msk.f32.vlgmr.msra.gmra.mxu1 %vm463_vm5, %v446_v37 }
 0x1aa   : > { %v484_v41 = vpop.f32.mrf.mxu1 }
 0x1ab   : > { %v485_v42 = vadd.f32 %v811_v40, %v484_v41 }
 0x1ad   : > { %813 = vtanh.f32 %v485_v42 }
 0x1b3   : > { %v814_v43 = vpop.eup %813 }
 0x1b4   : > { %490 = vrot.lane.b32.xlu1 %v814_v43, %s1034_s20  ;;  %v488_v47 = vmul.f32 %v814_v43, %v387_v15  ;;  %s963_s20 = scalar_lea.hbm %s962_s2, 2 }
 0x1b5   : > { %p964_p0 = scmp.ne.s32.totalorder %s962_s2, %s963_s20  ;;  %p969_p7 = scmp.lt.s32.totalorder %s967_s14, %s963_s20 }
 0x1b7   : > { %p965_p1 = pnand %p964_p0, %p1140_p5  ;;  %p970_p8 = por %p969_p7, %p968_p4 }
 0x1b9   : > { %p966_p3 = pneg %p965_p1 }
 0x1bb   : > { %p971_p9 = pnand %p970_p8, %p966_p3 }
 0x226   : > { %v491_v46 = vpop.permute.xlu1 %490 }
 0x227   : > { %v493_v48 = vmul.f32 %v814_v43, %v491_v46 }
 0x229   : > { %v494_v49 = vadd.f32 %v493_v48, %v488_v47 }
 0x22b   : > { %718 = vmatmul.msk.f32.vlgmr.msra.gmra.mxu2 %vm444_vm4, %v494_v49  ;;  %572 = vst.msk [vmem:[#allocation12] sm:$0x3] %vm570_vm6, %v494_v49  ;;  %815 = vtanh.f32 %v494_v49 }
 0x231   : > { %v816_v51 = vpop.eup %815 }
 0x2ae   : > { %v519_v50 = vpop.f32.mrf.mxu2 }
 0x2af   : > { %523 = vrot.lane.b32.xlu2 %v519_v50, %s1032_s19 }
 0x2b7   : > { %530 = vrot.lane.b32.xlu2 %v816_v51, %s1032_s19 }
 0x309   : > { %v524_v56 = vpop.permute.xlu2 %523 }
 0x30a   : > { %v526_v57 = vadd.f32 %v524_v56, %v485_v42 }
 0x30c   : > { %817 = vtanh.f32 %v526_v57 }
 0x311   : > { %v531_v58 = vpop.permute.xlu2 %530 }
 0x312   : > { %v818_v59 = vpop.eup %817 }
 0x313   : > { %v533_v60 = vmul.f32 %v818_v59, %v531_v58 }
 0x315   : > { %543 = vrot.lane.b32.xlu0 %v533_v60, %s1032_s19  ;;  %s612_s19 = sshll.u32 %s1328_s11, 4  ;;  %s613_s19 = int_to_ptr.hbm [resolvable:$true] %s612_s19 }
 0x387   : > { %v544_v61 = vpop.permute.xlu0 %543 }
 0x388   : > { %719 = vmatmul.msk.f32.vlgmr.msra.gmra.mxu3 %vm444_vm4, %v544_v61  ;;  %571 = vst.msk [vmem:[#allocation10] sm:$0x3] %vm570_vm6, %v544_v61 }
 0x389   : > { %738 = dma.vmem_to_hbm [thread:$0]  (%p222_p2), %s599_s29, 32, %s601_s13, [#allocation11]  }
 0x38a   : > { %740 = dma.vmem_to_hbm [thread:$0]  (%p222_p2), %s611_s25, 32, %s613_s19, [#allocation11]  }
 0x38b   : > { %s1338_s13 = scalar_lea.vmem [#allocation9], %s1179_s15  ;;  %s1340_s19 = sand.u32 1, %s1015_s22  }
 0x38c   : > { %s586_s16 = sshll.u32 %s1338_s13, 4  ;;  %s1339_s18 = smov %s1338_s13  ;;  %s587_s16 = int_to_ptr.vmem [resolvable:$true] %s586_s16 }
 0x38d   : > { %s574_s25 = scalar_lea.sflag [#allocation6], %s1340_s19 }
 0x40b   : > { %v564_v63 = vpop.f32.mrf.mxu3 }
 0x40c   : > { %v565_v0 = vadd.f32 %v812_v62, %v564_v63 }
 0x40e   : > { %568 = vst.msk [vmem:[%s1339_s18] sm:$0x3] %vm567_vm7, %v565_v0 }
 0x40f   : > { %974 = shalt.err (!%p971_p9)
}
 0x410   : > { %736 = dma.vmem_to_hbm [thread:$0]  (%p1140_p5), %s587_s16, 32, %s589_s17, %s574_s25  }
 0x411   : > { %1002 = dma.done.wait (%p222_p2), [#allocation11], 64  }
 0x412   : > { %1004 = vsyncadd (%p222_p2), [#allocation11], 4294967232 }
 0x413 PF: > { %p765_p10 = scmp.ge.s32.totalorder %s1023_s24, 2  ;;  %s634_s15 = sand.u32 1, %s1011_s21  }
 0x414   : > { %s635_s2 = scalar_lea.sflag [#allocation6], %s634_s15 }
 0x415   : > { %p754_p11 = pnand %p765_p10, %p1144_p6 }
 0x417   : > { %p755_p12 = pneg %p754_p11 }
 0x419   : > { %1006 = dma.done.wait (%p755_p12), %s635_s2, 32  }
 0x41a   : > { %1008 = vsyncadd (%p755_p12), %s635_s2, 4294967264  ;;  %s1341_s30 = sld [smem:[#allocation18_spill]]  ;;  %p33_p5 = scmp.ge.s32.totalorder %s1125_s26, 10  }
 0x41b   : > { %s1342_s21 = smov %s1015_s22  ;;  %s1343_s22 = smov %s1019_s23 }
 0x41c   : > { %s1345_s24 = smov %s1125_s26  ;;  %35 = sbr.rel (!%p33_p5) target bundleno = 13 (0xd), region = 113 }
 0x420   : > { %s1344_s23 = smov %s1341_s30 }
 0x421   :  { %641 = vsyncpa [#allocation5], 1 }
 0x422   :  { %643 = vsyncpa [#allocation5 + $0x1], 1 }
 0x423   :  { %644 = vsyncpa [#allocation8], 1 }
 0x424   :  { %645 = vsyncpa [#allocation6], 1 }
 0x425   :  { %647 = vsyncpa [#allocation6 + $0x1], 1 }
 0x426   :  { %648 = vsyncpa [#allocation11], 1 }

</bundles_post_ra>
